<compile_context>
chip_gen: v7x
topology: tpu7x:2x2x1
jax: 0.10.0
libtpu: 0.0.40
codegen_flags: <defaults>
</compile_context>

<pallas_src>
import functools

import jax
import jax.numpy as jnp
from jax.experimental import pallas as pl
from jax.experimental.pallas import tpu as pltpu

_LANE = 128
_SUBLANE = 8
# ~0.35 us per grid step expressed as an equivalent number of streamed rows.
_STEP_OVERHEAD_ROWS = 64


def _spectrum_filter_kernel(spec_ref, p_ref, out_ref, *, log):
    """Rescale the complex half-spectrum by the learned filter.

    spec_ref / out_ref : (Nb, 2, tile_rows, 128)   axis 1 = (re, im)
    p_ref              : (4,  tile_rows, 128)      = ReLU'd (W1, B1, W2, B2)
    """
    spec = spec_ref[...]
    re = spec[:, 0]
    im = spec[:, 1]
    w1 = p_ref[0]
    b1 = p_ref[1]
    w2 = p_ref[2]
    b2 = p_ref[3]

    m2 = re * re + im * im
    # Single EUP rsqrt replaces sqrt + reciprocal; eps keeps zero bins finite
    # (padded rows / true-zero bins: factor * 0 stays 0, never NaN).
    inv = jax.lax.rsqrt(m2 + 1e-32)
    init_spectrum = m2 * inv                       # == |X|
    pre = jnp.log1p(init_spectrum) if log else init_spectrum
    filt = w2 * jnp.maximum(w1 * pre + b1, 0.0) + b2
    factor = filt * inv                            # == filt / (|X| + eps)
    out_ref[...] = spec * factor[:, None, :, :]


def _vmem_budget():
    """(block_budget_bytes, vmem_limit_bytes), derived from the chip."""
    try:
        cap = int(pltpu.get_tpu_info().vmem_capacity_bytes)
    except Exception:
        cap = 64 * 1024 * 1024      # conservative (v7x-sized) fallback
    limit = max(16 * 1024 * 1024, min(cap * 3 // 4, 112 * 1024 * 1024))
    # Streamed double-buffered blocks get at most half the declared limit,
    # leaving headroom for compiler scratch / regalloc.
    return limit // 2, limit


def _round_up(v, m):
    return -(-v // m) * m


def _choose_tiling(L, N, budget_bytes):
    """Pick (rows_p, tile_rows, num_tiles, Nb) for the lane-dense layout.

    Per grid step we stream (spectrum in + out for Nb batch elements) plus the
    4 stacked params, each double-buffered:
        bytes/step ~= (4*Nb + 4) * tile_rows * 128 * 4 * 2
    """
    rows = -(-L // _LANE)
    rows_p = _round_up(rows, _SUBLANE)

    # Batch block: largest divisor of N that is <= 8.
    Nb = 1
    for d in range(min(N, 8), 0, -1):
        if N % d == 0:
            Nb = d
            break

    def tile_cap(nb):
        cap = budget_bytes // ((4 * nb + 4) * _LANE * 4 * 2)
        return max(_SUBLANE, (cap // _SUBLANE) * _SUBLANE)

    cap = tile_cap(Nb)

    if rows_p <= cap:
        tile_rows, num_tiles = rows_p, 1
        # Ensure >= 2 grid steps where cheaply possible so both TensorCores
        # (v7x megacore) get work.
        if N // Nb == 1 and num_tiles == 1:
            if N > 1:
                for d in range(Nb - 1, 0, -1):
                    if N % d == 0 and N // d >= 2:
                        Nb = d
                        break
            elif rows_p % (2 * _SUBLANE) == 0:
                tile_rows, num_tiles = rows_p // 2, 2
    else:
        # Choose tile_rows <= cap minimizing padded HBM traffic + step overhead.
        best = None
        for tr in range(_SUBLANE, cap + 1, _SUBLANE):
            steps = -(-rows_p // tr)
            cost = steps * tr + steps * _STEP_OVERHEAD_ROWS
            if best is None or cost < best[0] or (cost == best[0] and tr > best[1]):
                best = (cost, tr)
        tile_rows = best[1]
        rows_p = _round_up(rows_p, tile_rows)
        num_tiles = rows_p // tile_rows

    return rows_p, tile_rows, num_tiles, Nb


def general_fourier2d(x, W1, B1, W2, B2, *, log=True):
    """Pallas implementation of GeneralFourier2d.forward. x: (N, C, H, W) f32."""
    N, C, H, W = x.shape
    WF = W // 2 + 1
    assert W1.shape == (C, H, WF)

    L = C * H * WF
    budget, vmem_limit = _vmem_budget()
    rows_p, tile_rows, num_tiles, Nb = _choose_tiling(L, N, budget)
    Lp = rows_p * _LANE
    pad = Lp - L

    # TODO(synk): 3-D rFFT/irFFT have no Pallas TPU primitive; computed with
    # jnp.fft (norm="ortho" matches torch.rfft/irfft normalized=True, onesided=True).
    X = jnp.fft.rfftn(x.astype(jnp.float32), axes=(1, 2, 3), norm="ortho")

    # Stack re/im into one lane-dense operand: (N, 2, rows_p, 128).
    ri = jnp.stack([jnp.real(X).reshape(N, L), jnp.imag(X).reshape(N, L)], axis=1)
    ri = jnp.pad(ri, ((0, 0), (0, 0), (0, pad))).reshape(N, 2, rows_p, _LANE)

    # Stack the 4 parameters (ReLU hoisted here; padded region stays 0 so the
    # padded filter output is exactly 0): (4, rows_p, 128).
    params = jnp.stack([jax.nn.relu(W1), jax.nn.relu(B1),
                        jax.nn.relu(W2), jax.nn.relu(B2)]).astype(jnp.float32)
    params = jnp.pad(params.reshape(4, L), ((0, 0), (0, pad))).reshape(4, rows_p, _LANE)

    # Grid: (spectrum tile OUTER, batch INNER) -> param block resident across batch.
    spec_block = pl.BlockSpec((Nb, 2, tile_rows, _LANE), lambda t, n: (n, 0, t, 0))
    param_block = pl.BlockSpec((4, tile_rows, _LANE), lambda t, n: (0, t, 0))

    kernel = functools.partial(_spectrum_filter_kernel, log=log)

    out_spec = pl.pallas_call(
        kernel,
        out_shape=jax.ShapeDtypeStruct((N, 2, rows_p, _LANE), jnp.float32),
        grid_spec=pl.GridSpec(
            grid=(num_tiles, N // Nb),
            in_specs=[spec_block, param_block],
            out_specs=spec_block,
        ),
        # The stacked spectrum is dead after the kernel: rescale it in place.
        input_output_aliases={0: 0},
        compiler_params=pltpu.CompilerParams(
            dimension_semantics=("parallel", "parallel"),
            vmem_limit_bytes=vmem_limit),
    )(ri, params)

    filt = out_spec.reshape(N, 2, Lp)[:, :, :L]
    Xf = jax.lax.complex(filt[:, 0], filt[:, 1]).reshape(N, C, H, WF)
    out = jnp.fft.irfftn(Xf, s=(C, H, W), axes=(1, 2, 3), norm="ortho")
    return out.astype(x.dtype)


def _reference_forward(x, W1, B1, W2, B2, *, log=True):
    """Pure-JAX reference mirroring the PyTorch forward."""
    X = jnp.fft.rfftn(x.astype(jnp.float32), axes=(1, 2, 3), norm="ortho")
    re, im = jnp.real(X), jnp.imag(X)
    w1 = jax.nn.relu(W1)[None]
    b1 = jax.nn.relu(B1)[None]
    w2 = jax.nn.relu(W2)[None]
    b2 = jax.nn.relu(B2)[None]
    spec = jnp.sqrt(re * re + im * im)
    pre = jnp.log1p(spec) if log else spec
    filt = w2 * jax.nn.relu(w1 * pre + b1) + b2
    fac = filt / (spec + 1e-16)
    Xf = (re * fac + 1j * (im * fac)).astype(jnp.complex64)
    return jnp.fft.irfftn(Xf, s=x.shape[1:], axes=(1, 2, 3), norm="ortho")


if __name__ == "__main__":
    N, C, H, W = 2, 4, 16, 16
    WF = W // 2 + 1
    LOG = True

    key = jax.random.PRNGKey(0)
    kx, k1, k2, k3, k4 = jax.random.split(key, 5)

    x = jax.random.normal(kx, (N, C, H, W), dtype=jnp.float32)

    # Module __init__ uses ones/zeros; perturb deterministically so the
    # spectral filter is non-trivial (shapes: (C, H, W//2 + 1)).
    W1 = jnp.ones((C, H, WF), jnp.float32) + 0.1 * jax.random.normal(k1, (C, H, WF))
    B1 = jnp.zeros((C, H, WF), jnp.float32) + 0.1 * jax.random.normal(k2, (C, H, WF))
    W2 = jnp.ones((C, H, WF), jnp.float32) + 0.1 * jax.random.normal(k3, (C, H, WF))
    B2 = jnp.zeros((C, H, WF), jnp.float32) + 0.1 * jax.random.normal(k4, (C, H, WF))

    out = general_fourier2d(x, W1, B1, W2, B2, log=LOG)
    out = jax.block_until_ready(out)

    ref = _reference_forward(x, W1, B1, W2, B2, log=LOG)
    assert out.shape == x.shape and out.dtype == x.dtype
    assert jnp.allclose(out, ref, atol=1e-4, rtol=1e-4), "mismatch vs reference"

    print("KERNEL_OK")
</pallas_src>

<mosaic_0001>
module attributes {stable_mosaic.version = 11 : i64} {
  func.func @_spectrum_filter_kernel(%arg0: i32, %arg1: i32, %arg2: memref<1x2x8x128xf32, #tpu.memory_space<vmem>>, %arg3: memref<4x8x128xf32, #tpu.memory_space<vmem>>, %arg4: memref<1x2x8x128xf32, #tpu.memory_space<vmem>>) attributes {dimension_semantics = [#tpu.dimension_semantics<parallel>, #tpu.dimension_semantics<parallel>], iteration_bounds = array<i64: 1, 2>, scalar_prefetch = 0 : i64, scratch_operands = 0 : i64, tpu.core_type = #tpu.core_type<tc>, window_params = [{transform_indices = @transform_0, window_bounds = array<i64: 1, 2, 8, 128>}, {transform_indices = @transform_1, window_bounds = array<i64: 4, 8, 128>}, {transform_indices = @transform_2, window_bounds = array<i64: 1, 2, 8, 128>}]} {
    %c0 = arith.constant 0 : index
    %c0_0 = arith.constant 0 : index
    %c0_1 = arith.constant 0 : index
    %c0_2 = arith.constant 0 : index
    %0 = vector.load %arg2[%c0, %c0_0, %c0_1, %c0_2] : memref<1x2x8x128xf32, #tpu.memory_space<vmem>>, vector<1x2x8x128xf32>
    %1 = vector.extract_strided_slice %0 {offsets = [0, 0, 0, 0], sizes = [1, 1, 8, 128], strides = [1, 1, 1, 1]} : vector<1x2x8x128xf32> to vector<1x1x8x128xf32>
    %2 = vector.shape_cast %1 : vector<1x1x8x128xf32> to vector<1x8x128xf32>
    %3 = vector.extract_strided_slice %0 {offsets = [0, 1, 0, 0], sizes = [1, 1, 8, 128], strides = [1, 1, 1, 1]} : vector<1x2x8x128xf32> to vector<1x1x8x128xf32>
    %4 = vector.shape_cast %3 : vector<1x1x8x128xf32> to vector<1x8x128xf32>
    %c0_3 = arith.constant 0 : index
    %c0_4 = arith.constant 0 : index
    %c0_5 = arith.constant 0 : index
    %5 = vector.load %arg3[%c0_3, %c0_4, %c0_5] : memref<4x8x128xf32, #tpu.memory_space<vmem>>, vector<1x8x128xf32>
    %6 = vector.shape_cast %5 : vector<1x8x128xf32> to vector<8x128xf32>
    %c1 = arith.constant 1 : index
    %c0_6 = arith.constant 0 : index
    %c0_7 = arith.constant 0 : index
    %7 = vector.load %arg3[%c1, %c0_6, %c0_7] : memref<4x8x128xf32, #tpu.memory_space<vmem>>, vector<1x8x128xf32>
    %8 = vector.shape_cast %7 : vector<1x8x128xf32> to vector<8x128xf32>
    %c2 = arith.constant 2 : index
    %c0_8 = arith.constant 0 : index
    %c0_9 = arith.constant 0 : index
    %9 = vector.load %arg3[%c2, %c0_8, %c0_9] : memref<4x8x128xf32, #tpu.memory_space<vmem>>, vector<1x8x128xf32>
    %10 = vector.shape_cast %9 : vector<1x8x128xf32> to vector<8x128xf32>
    %c3 = arith.constant 3 : index
    %c0_10 = arith.constant 0 : index
    %c0_11 = arith.constant 0 : index
    %11 = vector.load %arg3[%c3, %c0_10, %c0_11] : memref<4x8x128xf32, #tpu.memory_space<vmem>>, vector<1x8x128xf32>
    %12 = vector.shape_cast %11 : vector<1x8x128xf32> to vector<8x128xf32>
    %13 = arith.mulf %2, %2 : vector<1x8x128xf32>
    %14 = arith.mulf %4, %4 : vector<1x8x128xf32>
    %15 = arith.addf %13, %14 : vector<1x8x128xf32>
    %cst = arith.constant 1.000000e-32 : f32
    %16 = vector.broadcast %cst : f32 to vector<1x8x128xf32>
    %17 = arith.addf %15, %16 : vector<1x8x128xf32>
    %18 = math.rsqrt %17 : vector<1x8x128xf32>
    %19 = arith.mulf %15, %18 : vector<1x8x128xf32>
    %20 = math.log1p %19 : vector<1x8x128xf32>
    %21 = vector.shape_cast %6 : vector<8x128xf32> to vector<1x8x128xf32>
    %22 = arith.mulf %21, %20 : vector<1x8x128xf32>
    %23 = vector.shape_cast %8 : vector<8x128xf32> to vector<1x8x128xf32>
    %24 = arith.addf %22, %23 : vector<1x8x128xf32>
    %cst_12 = arith.constant 0.000000e+00 : f32
    %25 = vector.broadcast %cst_12 : f32 to vector<1x8x128xf32>
    %26 = arith.maximumf %24, %25 : vector<1x8x128xf32>
    %27 = vector.shape_cast %10 : vector<8x128xf32> to vector<1x8x128xf32>
    %28 = arith.mulf %27, %26 : vector<1x8x128xf32>
    %29 = vector.shape_cast %12 : vector<8x128xf32> to vector<1x8x128xf32>
    %30 = arith.addf %28, %29 : vector<1x8x128xf32>
    %31 = arith.mulf %30, %18 : vector<1x8x128xf32>
    %32 = vector.shape_cast %31 : vector<1x8x128xf32> to vector<1x1x8x128xf32>
    %33 = vector.broadcast %32 : vector<1x1x8x128xf32> to vector<1x2x8x128xf32>
    %34 = arith.mulf %0, %33 : vector<1x2x8x128xf32>
    %c0_13 = arith.constant 0 : index
    %c0_14 = arith.constant 0 : index
    %c0_15 = arith.constant 0 : index
    %c0_16 = arith.constant 0 : index
    %35 = vector.load %arg4[%c0_13, %c0_14, %c0_15, %c0_16] : memref<1x2x8x128xf32, #tpu.memory_space<vmem>>, vector<1x2x8x128xf32>
    tpu.vector_store %arg4[%c0_13, %c0_14, %c0_15, %c0_16], %34 {strides = array<i32>} : memref<1x2x8x128xf32, #tpu.memory_space<vmem>>, vector<1x2x8x128xf32>,
    return
  }
  func.func @transform_0(%arg0: i32, %arg1: i32) -> (i32, i32, i32, i32) {
    %c0_i32 = arith.constant 0 : i32
    %c0_i32_0 = arith.constant 0 : i32
    %c0_i32_1 = arith.constant 0 : i32
    return %arg1, %c0_i32, %arg0, %c0_i32_0 : i32, i32, i32, i32
  }
  func.func @transform_1(%arg0: i32, %arg1: i32) -> (i32, i32, i32) {
    %c0_i32 = arith.constant 0 : i32
    %c0_i32_0 = arith.constant 0 : i32
    %c0_i32_1 = arith.constant 0 : i32
    return %c0_i32, %arg0, %c0_i32_0 : i32, i32, i32
  }
  func.func @transform_2(%arg0: i32, %arg1: i32) -> (i32, i32, i32, i32) {
    %c0_i32 = arith.constant 0 : i32
    %c0_i32_0 = arith.constant 0 : i32
    %c0_i32_1 = arith.constant 0 : i32
    return %arg1, %c0_i32, %arg0, %c0_i32_0 : i32, i32, i32, i32
  }
}

</mosaic_0001>

<bundles_post_ra>
// kernel: tpu_custom_call.1
= control target key start
LH: loop header
LB: loop body
LE: loop exit
PB: predicated region body
PF: predicated region fallthrough
CT: control target
= control target key end

     0   :  { %7 = vsyncpa [#allocation3], 0  ;;  %s762_s0 = inlined_call_operand.hbm [shape: f32[2,2,8,128], index: 0, kind: input, shape index: {}, may-alias: {0,2}]   ;;  %s763_s1 = inlined_call_operand.vmem [shape: f32[4,8,128], index: 1, kind: input, shape index: {}]   ;;  %s764_s2 = inlined_call_operand.hbm [shape: f32[2,2,8,128], index: 2, kind: output, shape index: {}, may-alias: {0,2}]  }
   0x1   :  { %9 = vsyncpa [#allocation3 + $0x1], 0 }
   0x2   :  { %10 = vsyncpa [#allocation4], 0 }
   0x3   :  { %12 = vsyncpa [#allocation4 + $0x1], 0  ;;  %s571_s9 = smov 0   ;;  %s573_s10 = smov 0  }
   0x4   :  { %s575_s11 = smov 0   ;;  %s577_s12 = smov 0  }
   0x5   :  { %s579_s13 = smov 0   ;;  %s581_s14 = smov 0  }
   0x6 LB: > { %s345_s15 = sadd.s32 4294967295, %s548_s14   ;;  %s346_s16 = sadd.s32 4294967294, %s548_s14   ;;  %s548_s14 = sphi %s581_s14, %s18_s14   ;;  %s544_s13 = sphi %s579_s13, %s779_s13   ;;  %s540_s12 = sphi %s577_s12, %s778_s12   ;;  %s536_s11 = sphi %s575_s11, %s777_s11   ;;  %s532_s10 = sphi %s573_s10, %s776_s10   ;;  %s528_s9 = sphi %s571_s9, %s775_s9  }
   0x7   : > { %s27_s17 = sadd.s32 1, %s544_s13  ;;  %s39_s18 = sadd.s32 1, %s536_s11 }
   0x8   : > { %p28_p0 = scmp.ge.s32.totalorder %s27_s17, 2  ;;  %p46_p1 = scmp.ne.s32.totalorder %s536_s11, %s532_s10 }
   0x9   : > { %p47_p2 = scmp.eq.s32.totalorder %s548_s14, 0  ;;  %p52_p3 = scmp.ne.s32.totalorder %s532_s10, %s528_s9 }
   0xa   : > { %s781_s17 = smov (%p28_p0, %s27_s17), 0  ;;  %p53_p5 = scmp.eq.s32.totalorder %s345_s15, 0 }
   0xb   : > { %p612_p4 = por %p47_p2, %p46_p1  ;;  %s34_s20 = ssub.s32 %s544_s13, %s781_s17 }
   0xc   : > { %p104_p6 = scmp.eq.s32.totalorder %s345_s15, 1  ;;  %p37_p7 = scmp.eq.s32.totalorder %s34_s20, 0 }
   0xd   : > { %p618_p8 = por %p53_p5, %p52_p3  ;;  %p110_p10 = scmp.eq.s32.totalorder %s346_s16, 1 }
   0xe   : > { %p622_p9 = por %p104_p6, %p46_p1  ;;  %p378_p13 = scmp.lt.s32.totalorder %s548_s14, 2 }
   0xf   : > { %s627_s23 = scalar_select %p37_p7, %s536_s11, %s39_s18  }
  0x10   : > { %s768_s22 = scalar_select %p622_p9, 1, 0 }
  0x11   : > { %p629_p11 = por %p110_p10, %p52_p3  ;;  %s137_s25 = sand.u32 1, %s536_s11  }
  0x12   : > { %s350_s26 = sshll.u32 %s137_s25, 4  ;;  %s364_s27 = sshll.u32 %s544_s13, 8 }
  0x13   : > { %s769_s24 = scalar_select %p629_p11, 1, 0 }
  0x14   : > { %s640_s30 = scalar_lea.hbm %s762_s0, %s364_s27  ;;  %s141_s3 = scalar_lea.vmem [#allocation2], %s350_s26 }
  0x15   : > { %s149_s4 = sshll.u32 %s141_s3, 4  ;;  %p646_p0 = pnand %p378_p13, %p612_p4  ;;  %s642_s4 = int_to_ptr.vmem [resolvable:$true] %s149_s4 }
  0x16   : > { %s651_s6 = scalar_lea.sflag [#allocation3], %s137_s25  ;;  %s436_s7 = scalar_lea.hbm %s640_s30, 256 }
  0x17   : > { %p437_p2 = scmp.ne.s32.totalorder %s640_s30, %s436_s7  ;;  %p438_p3 = pneg %p646_p0 }
  0x18   : > { %s441_s16 = scalar_lea.hbm %s762_s0, 512  ;;  %p442_p4 = scmp.lt.u32.totalorder %s640_s30, %s762_s0 }
  0x19   : > { %p439_p5 = pnand %p438_p3, %p437_p2  ;;  %p443_p7 = scmp.lt.u32.totalorder %s441_s16, %s436_s7 }
  0x1a   : > { %p445_p13 = scmp.lt.u32.totalorder %s436_s7, %s640_s30 }
  0x1b   : > { %p440_p6 = pneg %p439_p5  ;;  %p444_p10 = por %p443_p7, %p442_p4 }
  0x1d   : > { %p446_p12 = por %p445_p13, %p444_p10 }
  0x1f   : > { %p447_p1 = pnand %p446_p12, %p440_p6 }
  0x21   : > { %450 = shalt.err (!%p447_p1)
}
  0x22   : > { %s451_s20 = scalar_lea.vmem %s642_s4, 256  ;;  %s550_s25 = smov [#allocation2]  }
  0x23   : > { %p452_p2 = scmp.ne.s32.totalorder %s642_s4, %s451_s20  ;;  %s456_s26 = sshll.u32 %s550_s25, 4  ;;  %s457_s26 = int_to_ptr.vmem [resolvable:$false] %s456_s26 }
  0x24   : > { %s458_s27 = scalar_lea.vmem %s457_s26, 512  ;;  %p459_p9 = scmp.lt.s32.totalorder %s642_s4, %s457_s26 }
  0x25   : > { %p454_p5 = pnand %p452_p2, %p438_p3  ;;  %p460_p4 = scmp.lt.s32.totalorder %s458_s27, %s451_s20 }
  0x27   : > { %p455_p11 = pneg %p454_p5  ;;  %p461_p7 = por %p460_p4, %p459_p9 }
  0x29   : > { %p462_p10 = pnand %p461_p7, %p455_p11 }
  0x2b   : > { %465 = shalt.err (!%p462_p10)
}
  0x2c   : > { %s551_s28 = smov 128   ;;  %s552_s29 = smov 8  }
  0x2d   : > { %373 = dma.hbm_to_vmem [thread:$0]  (!%p646_p0), %s640_s30, 256, %s642_s4, %s651_s6, %s551_s28, %s551_s28, %s552_s29  }
  0x2e   : > { %p157_p12 = scmp.lt.s32.totalorder %s548_s14, 3  ;;  %p771_p1 = scmp.ge.s32.totalorder %s548_s14, 1 }
  0x30   : > { %p158_p3 = pnand %p771_p1, %p157_p12 }
  0x31   : > { %s683_s3 = sand.u32 (!%p158_p3), 1, %s532_s10  }
  0x32   : > { %161 = sbr.rel (%p158_p3) target bundleno = 123 (0x7b), region = 28  ;;  %s354_s7 = sshll.u32 (!%p158_p3), %s683_s3, 4 }
  0x33   : > { %s164_s8 = scalar_lea.sflag (!%p158_p3), [#allocation3], %s683_s3  ;;  %s167_s15 = scalar_lea.vmem (!%p158_p3), [#allocation2], %s354_s7 }
  0x39   : > { %519 = dma.done.wait (%p618_p8), %s164_s8, 256  }
  0x3a   : > { %521 = vsyncadd (%p618_p8), %s164_s8, 4294967040  ;;  %v196_v0 = vld [vmem:[%s167_s15] sm:$0xff]  ;;  %v197_v1 = vld [vmem:[%s167_s15 + $0x8] sm:$0xff]  ;;  %s191_s20 = scalar_lea.vmem [#allocation5], %s354_s7  ;;  %s365_s26 = sshll.u32 %s540_s12, 8 }
  0x3b   : > { %v205_v2 = vmul.f32 %v196_v0, %v196_v0  ;;  %v206_v3 = vmul.f32 %v197_v1, %v197_v1  ;;  %v198_v14 = vld [vmem:[%s763_s1] sm:$0xff]  ;;  %v356_v16 = vld [vmem:[%s763_s1 + $0x8] sm:$0xff]  ;;  %v357_v20 = vld [vmem:[%s763_s1 + $0x10] sm:$0xff]  ;;  %s245_s25 = sshll.u32 %s191_s20, 4  ;;  %s713_s29 = scalar_lea.hbm %s764_s2, %s365_s26  ;;  %s708_s25 = int_to_ptr.vmem [resolvable:$true] %s245_s25 }
  0x3c   : > { %v358_v22 = vld [vmem:[%s763_s1 + $0x18] sm:$0xff]  ;;  %s231_s8 = scalar_lea.sflag [#allocation4], %s683_s3  ;;  %s466_s15 = scalar_lea.vmem %s708_s25, 256 }
  0x3d   : > { %v207_v4 = vadd.f32 %v206_v3, %v205_v2  ;;  %p467_p8 = scmp.ne.s32.totalorder %s708_s25, %s466_s15  ;;  %p772_p9 = scmp.ne.s32.totalorder %s768_s22, 0 }
  0x3e   : > { %s553_s12 = smov [#allocation5]  }
  0x3f   : > { %v208_v5 = vadd.f32 1e-32, %v207_v4  ;;  %p468_p11 = pnand %p467_p8, %p772_p9  ;;  %s470_s7 = sshll.u32 %s553_s12, 4  ;;  %s471_s7 = int_to_ptr.vmem [resolvable:$false] %s470_s7 }
  0x40   : > { %s472_s21 = scalar_lea.vmem %s471_s7, 512  ;;  %p473_p6 = scmp.lt.s32.totalorder %s708_s25, %s471_s7 }
  0x41   : > { %432 = vrsqrt.f32 %v208_v5  ;;  %p469_p0 = pneg %p468_p11  ;;  %p474_p13 = scmp.lt.s32.totalorder %s472_s21, %s466_s15 }
  0x43   : > { %p475_p2 = por %p474_p13, %p473_p6 }
  0x45   : > { %p476_p5 = pnand %p475_p2, %p469_p0 }
  0x4b   : > { %v433_v6 = vpop.eup %432 }
  0x4c   : > { %v210_v7 = vmul.f32 %v433_v6, %v207_v4 }
  0x4e   : > { %v211_v8 = vadd.f32 1.0, %v210_v7  ;;  %v214_v9 = vmul.f32 -0.5, %v210_v7  ;;  %v217_v11 = vand.u32 2147483647, %v210_v7 }
  0x50   : > { %434 = vlog2.f32 %v211_v8  ;;  %v215_v10 = vadd.f32 1.0, %v214_v9  ;;  %vm218_vm0 = vcmp.lt.f32.partialorder %v217_v11, 0.0004427343 }
  0x52   : > { %v216_v12 = vmul.f32 %v215_v10, %v210_v7 }
  0x5a   : > { %v435_v13 = vpop.eup %434 }
  0x5b   : > { %v213_v15 = vmul.f32 0.6931472, %v435_v13 }
  0x5d   : > { %v219_v17 = vsel %vm218_vm0, %v216_v12, %v213_v15 }
  0x5e   : > { %v220_v18 = vmul.f32 %v219_v17, %v198_v14 }
  0x60   : > { %v221_v19 = vadd.f32 %v356_v16, %v220_v18 }
  0x62   : > { %v222_v21 = vmax.f32 %v221_v19, 0.0 }
  0x64   : > { %v223_v23 = vmul.f32 %v357_v20, %v222_v21 }
  0x66   : > { %v224_v24 = vadd.f32 %v358_v22, %v223_v23 }
  0x68   : > { %v225_v25 = vmul.f32 %v433_v6, %v224_v24 }
  0x6a   : > { %v226_v26 = vmul.f32 %v225_v25, %v196_v0  ;;  %v227_v27 = vmul.f32 %v225_v25, %v197_v1 }
  0x6c   : > { %228 = vst [vmem:[%s191_s20] sm:$0xff] %v226_v26  ;;  %229 = vst [vmem:[%s191_s20 + $0x8] sm:$0xff] %v227_v27 }
  0x6d   : > { %479 = shalt.err (!%p476_p5)
}
  0x6e   : > { %s480_s30 = scalar_lea.hbm %s713_s29, 256  ;;  %s484_s6 = scalar_lea.hbm %s764_s2, 512 }
  0x6f   : > { %p481_p4 = scmp.ne.s32.totalorder %s713_s29, %s480_s30  ;;  %p485_p12 = scmp.lt.u32.totalorder %s713_s29, %s764_s2 }
  0x70   : > { %p486_p1 = scmp.lt.u32.totalorder %s484_s6, %s480_s30  ;;  %p488_p8 = scmp.lt.u32.totalorder %s480_s30, %s713_s29 }
  0x71   : > { %p482_p7 = pnand %p481_p4, %p772_p9 }
  0x72   : > { %p487_p3 = por %p486_p1, %p485_p12 }
  0x73   : > { %p483_p10 = pneg %p482_p7 }
  0x74   : > { %p489_p11 = por %p488_p8, %p487_p3 }
  0x76   : > { %p490_p0 = pnand %p489_p11, %p483_p10 }
  0x78   : > { %493 = shalt.err (!%p490_p0)
}
  0x79   : > { %s554_s19 = smov 128   ;;  %s555_s20 = smov 8  }
  0x7a   : > { %368 = dma.vmem_to_hbm [thread:$0]  (%p772_p9), %s708_s25, 256, %s713_s29, %s231_s8, %s554_s19, %s554_s19, %s555_s20  }
  0x7b PF: > { %s260_s26 = sand.u32 1, %s528_s9   ;;  %p773_p6 = scmp.ne.s32.totalorder %s769_s24, 0 }
  0x7c   : > { %p774_p13 = scmp.ge.s32.totalorder %s548_s14, 2  ;;  %s261_s27 = scalar_lea.sflag [#allocation4], %s260_s26 }
  0x7e   : > { %p375_p2 = pnand %p774_p13, %p773_p6 }
  0x80   : > { %523 = dma.done.wait (!%p375_p2), %s261_s27, 256  }
  0x81   : > { %525 = vsyncadd (!%p375_p2), %s261_s27, 4294967040  ;;  %s18_s14 = sadd.s32 1, %s548_s14   ;;  %s775_s9 = smov %s532_s10 }
  0x82   : > { %p15_p5 = scmp.ge.s32.totalorder %s18_s14, 4   ;;  %s776_s10 = smov %s536_s11 }
  0x83   : > { %s777_s11 = smov %s627_s23  ;;  %s778_s12 = smov %s544_s13 }
  0x84   : > { %s779_s13 = smov %s781_s17  ;;  %17 = sbr.rel (!%p15_p5) target bundleno = 6 (0x6), region = 79 }
  0x8b   :  { %266 = vsyncpa [#allocation3], 1 }
  0x8c   :  { %268 = vsyncpa [#allocation3 + $0x1], 1 }
  0x8d   :  { %269 = vsyncpa [#allocation4], 1 }
  0x8e   :  { %271 = vsyncpa [#allocation4 + $0x1], 1 }

</bundles_post_ra>
